<compile_context>
chip_gen: v7x
topology: tpu7x:2x2x1
jax: 0.10.0
libtpu: 0.0.40
codegen_flags: <defaults>
</compile_context>

<pallas_src>
import jax
import jax.numpy as jnp
from jax.experimental import pallas as pl
from jax.experimental.pallas import tpu as pltpu


def _round_up(x, m):
    return ((x + m - 1) // m) * m


def _vmem_limit_bytes():
    # 32 MiB is safe on every generation (v7x scoped ceiling).  Only raise it
    # when the device positively reports the 128 MiB-class VMEM of v5e/v6e.
    limit = 32 << 20
    try:
        info_fn = getattr(pltpu, "get_tpu_info", None)
        if info_fn is not None:
            cap = int(getattr(info_fn(), "vmem_capacity_bytes", 0))
            if cap >= (128 << 20):
                limit = 96 << 20
    except Exception:
        pass
    return limit


# ---------------------------- Pallas kernels ----------------------------

def _linear_kernel(x_ref, w_ref, b_ref, o_ref):
    # y = x @ W + b   (bf16 operands, f32 MXU accumulation; W stored [in, out])
    o_ref[...] = (
        jnp.dot(x_ref[...], w_ref[...], preferred_element_type=jnp.float32)
        + b_ref[...]
    )


def pallas_linear(x, w, b, *, block_rows=1024):
    """Row-tiled fused matmul+bias.  x:(M,K) bf16, w:(K,N) bf16, b:(N,) f32 -> (M,N) f32."""
    m, k = x.shape
    n = w.shape[1]
    mp = _round_up(m, 8)
    if mp != m:
        x = jnp.pad(x, ((0, mp - m), (0, 0)))
    tm = min(block_rows, mp)
    out = pl.pallas_call(
        _linear_kernel,
        out_shape=jax.ShapeDtypeStruct((mp, n), jnp.float32),
        grid=(pl.cdiv(mp, tm),),
        in_specs=[
            pl.BlockSpec((tm, k), lambda i: (i, 0)),
            pl.BlockSpec((k, n), lambda i: (0, 0)),   # weights VMEM-resident
            pl.BlockSpec((1, n), lambda i: (0, 0)),   # bias VMEM-resident
        ],
        out_specs=pl.BlockSpec((tm, n), lambda i: (i, 0)),
        compiler_params=pltpu.CompilerParams(
            dimension_semantics=("parallel",),
            vmem_limit_bytes=_vmem_limit_bytes(),
        ),
    )(x, w, b.reshape(1, n))
    return out[:m]


def _attn_output_kernel(q_ref, kv_ref, hd_ref, hm_ref, gm_ref,
                        w_ref, b_ref, gamma_ref, beta_ref, o_ref):
    # Packed layout: each row holds g destination nodes along the lanes.
    #   q:  (TD, G) bf16            G = g * dim_out  (=128 for dim_out=32)
    #   kv: (NBR, TD, 2G) bf16      lanes = [K(packed) | V(packed)]
    #   hd: (TD, g*dim_node) bf16
    nbr, td, _ = kv_ref.shape
    lanes = q_ref.shape[-1]

    kv = kv_ref[...]
    k = kv[:, :, :lanes].astype(jnp.float32)
    v = kv[:, :, lanes:].astype(jnp.float32)
    q = q_ref[...].astype(jnp.float32)

    # attention scores: per-(dst, head) segment-sum of q*k done as one MXU
    # matmul with a constant block-diagonal head mask (sum + broadcast-back).
    qk = q[None, :, :] * k                                          # (NBR, TD, G)
    s = jnp.dot(qk.reshape(nbr * td, lanes), hm_ref[...],
                preferred_element_type=jnp.float32).reshape(nbr, td, lanes)
    s = jnp.where(s >= 0.0, s, 0.2 * s)                             # LeakyReLU(0.2)

    # edge_softmax over the neighbor (leading) axis
    m = jnp.max(s, axis=0, keepdims=True)
    e = jnp.exp(s - m)
    denom = jnp.sum(e, axis=0, keepdims=True)
    p = e * pl.reciprocal(denom, approx=True)                       # EUP reciprocal
    # TODO(synk): attention dropout is identity here (eval-mode semantics).

    attn = jnp.sum(p * v, axis=0)                                   # (TD, G)

    # fused output stage: one matmul for w_out(cat([attn, h_dst])) -> ReLU ->
    # grouped (per-dst lane group) LayerNorm via a constant mask matmul.
    x = jnp.concatenate([attn.astype(jnp.bfloat16), hd_ref[...]], axis=-1)
    y = jnp.dot(x, w_ref[...], preferred_element_type=jnp.float32) + b_ref[...]
    # TODO(synk): dropout before ReLU is identity here (eval-mode semantics).
    y = jnp.maximum(y, 0.0)
    mu = jnp.dot(y, gm_ref[...], preferred_element_type=jnp.float32)
    c = y - mu
    var = jnp.dot(c * c, gm_ref[...], preferred_element_type=jnp.float32)
    o_ref[...] = c * jax.lax.rsqrt(var + 1e-5) * gamma_ref[...] + beta_ref[...]


def _auto_row_block(nbr, lanes, lanes_h):
    """Packed-row tile derived from the VMEM budget (double-buffered inputs)."""
    budget = _vmem_limit_bytes() // 2
    per_row = 2 * (nbr * 2 * lanes * 2      # kv bf16, double-buffered
                   + lanes * 2              # q bf16
                   + lanes_h * 2            # h_dst bf16
                   + lanes * 4)             # packed f32 output
    rows = max(8, (budget // max(per_row, 1)) // 8 * 8)
    return int(min(rows, 4096))


def pallas_attention_output(q_pk, kv_pk, hd_pk, head_mask, group_mask,
                            w_fused, b_pk, gamma_pk, beta_pk):
    """Fused edge-attention + output projection + grouped LayerNorm (packed)."""
    nbr, dpg, lanes2 = kv_pk.shape
    lanes = lanes2 // 2
    lanes_h = hd_pk.shape[1]

    td = min(_auto_row_block(nbr, lanes, lanes_h), dpg)
    # make sure both v7x TensorCores get work when there are enough rows
    if dpg >= 16 and dpg // td < 2:
        td = max(8, _round_up(dpg // 2, 8))

    return pl.pallas_call(
        _attn_output_kernel,
        out_shape=jax.ShapeDtypeStruct((dpg, lanes), jnp.float32),
        grid=(pl.cdiv(dpg, td),),
        in_specs=[
            pl.BlockSpec((td, lanes), lambda i: (i, 0)),            # q packed
            pl.BlockSpec((nbr, td, lanes2), lambda i: (0, i, 0)),   # K|V packed (one stream)
            pl.BlockSpec((td, lanes_h), lambda i: (i, 0)),          # h_dst packed
            pl.BlockSpec((lanes, lanes), lambda i: (0, 0)),         # head mask (resident)
            pl.BlockSpec((lanes, lanes), lambda i: (0, 0)),         # LN group mask (resident)
            pl.BlockSpec((lanes + lanes_h, lanes), lambda i: (0, 0)),  # fused w_out (resident)
            pl.BlockSpec((1, lanes), lambda i: (0, 0)),             # bias (resident)
            pl.BlockSpec((1, lanes), lambda i: (0, 0)),             # gamma (resident)
            pl.BlockSpec((1, lanes), lambda i: (0, 0)),             # beta (resident)
        ],
        out_specs=pl.BlockSpec((td, lanes), lambda i: (i, 0)),
        compiler_params=pltpu.CompilerParams(
            dimension_semantics=("parallel",),
            vmem_limit_bytes=_vmem_limit_bytes(),
        ),
    )(q_pk, kv_pk, hd_pk, head_mask, group_mask, w_fused, b_pk, gamma_pk, beta_pk)


# ---------------------------- parameters (deterministic) ----------------------------

def init_params(key, dim_node, dim_edge, dim_time, dim_out):
    ks = jax.random.split(key, 6)

    def lin(k, din, dout):
        kw, kb = jax.random.split(k)
        w = jax.random.normal(kw, (din, dout), jnp.float32) / jnp.sqrt(din)
        b = jax.random.normal(kb, (dout,), jnp.float32) * 0.01
        return w, b

    return {
        # TimeEncode: cos(t * w + b), classic TGAT frequencies
        "time_w": (1.0 / (10.0 ** jnp.linspace(0.0, 9.0, dim_time))).astype(jnp.float32),
        "time_b": jnp.zeros((dim_time,), jnp.float32),
        "w_q_node": lin(ks[0], dim_node, dim_out),
        "w_q_time": lin(ks[1], dim_time, dim_out),
        "w_kv_node": lin(ks[2], dim_node, 2 * dim_out),
        "w_kv_edge": lin(ks[3], dim_edge, 2 * dim_out),
        "w_kv_time": lin(ks[4], dim_time, 2 * dim_out),
        "w_out": lin(ks[5], dim_node + dim_out, dim_out),
        "ln_gamma": jnp.ones((dim_out,), jnp.float32),
        "ln_beta": jnp.zeros((dim_out,), jnp.float32),
        # note: w_qkv_node exists in the torch __init__ but is never used in forward.
    }


# ---------------------------- forward (glue + kernels) ----------------------------

def temporal_attn_forward(params, num_heads, dim_out, num_dst, nbrs,
                          node_data, reverse_nids, efeat_unique, reverse_eids,
                          unique_time_delta, reverse_time_delta):
    d = num_dst
    bf16 = jnp.bfloat16
    head_dim = dim_out // num_heads
    dim_node = node_data.shape[1]

    # --- TimeEncode (glue): precomputed_zeros / precomputed_times ---
    tw, tb = params["time_w"], params["time_b"]
    zero_time_feat = jnp.cos(jnp.zeros((1, 1), jnp.float32) * tw[None, :] + tb[None, :])
    nbrs_time_feat = jnp.cos(unique_time_delta[:, None] * tw[None, :] + tb[None, :])

    node_dst_inverse = reverse_nids[:d]
    node_inverse = reverse_nids[d:]

    # --- fused node projection: [w_q_node | w_kv_node] in one row-tiled matmul ---
    wq_n, bq_n = params["w_q_node"]
    wkv_n, bkv_n = params["w_kv_node"]
    w_node = jnp.concatenate([wq_n, wkv_n], axis=1).astype(bf16)       # (dim_node, 3*dim_out)
    b_node = jnp.concatenate([bq_n, bkv_n], axis=0)
    qz_node_u = pallas_linear(node_data.astype(bf16), w_node, b_node)  # (Un, 3*dim_out)

    wkv_e, bkv_e = params["w_kv_edge"]
    z_edge_u = pallas_linear(efeat_unique.astype(bf16), wkv_e.astype(bf16), bkv_e)
    wkv_t, bkv_t = params["w_kv_time"]
    z_time_u = pallas_linear(nbrs_time_feat.astype(bf16), wkv_t.astype(bf16), bkv_t)
    # TODO(synk): the edge/time KV projections have <128-lane outputs; padding
    # them to 128 lanes (or fusing with a shared input) would remove the masked
    # partial stores at production scale.

    # q_time for the single zero dst-time row: 1 x dim_time matmul, negligible glue.
    wq_t, bq_t = params["w_q_time"]
    q_time_row = zero_time_feat @ wq_t + bq_t                          # (1, dim_out)

    # --- redundancy-removing gathers (XLA glue) ---
    # TODO(synk): at production graph sizes this gather+add should move inside
    # the attention kernel (scalar-prefetched indices + VMEM-resident unique
    # tables) to avoid the (E, 2*dim_out) HBM round trip.
    q_our = qz_node_u[node_dst_inverse, :dim_out] + q_time_row         # (D, dim_out) f32
    z_our = (qz_node_u[node_inverse, dim_out:]
             + z_edge_u[reverse_eids]
             + z_time_u[reverse_time_delta]).astype(bf16)              # (E, 2*dim_out) bf16
    h_dst = node_data[node_dst_inverse].astype(bf16)                   # (D, dim_node)

    # --- lane-dense packing: g dst rows share a 128-lane group ---
    g = 128 // dim_out if (dim_out <= 128 and 128 % dim_out == 0) else 1
    dp = _round_up(d, 8 * g)
    dpg = dp // g
    lanes = g * dim_out

    q_pk = jnp.pad(q_our, ((0, dp - d), (0, 0))).reshape(dpg, lanes).astype(bf16)
    hd_pk = jnp.pad(h_dst, ((0, dp - d), (0, 0))).reshape(dpg, g * dim_node)

    # edges are dst-major (edge e = dst*nbrs + n) -> neighbor-major packed K|V
    z4 = jnp.pad(z_our.reshape(d, nbrs, 2, dim_out),
                 ((0, dp - d), (0, 0), (0, 0), (0, 0)))
    z4 = z4.transpose(2, 1, 0, 3).reshape(2, nbrs, dpg, lanes)
    kv_pk = jnp.concatenate([z4[0], z4[1]], axis=-1)                   # (NBR, dpg, 2*lanes) bf16

    # --- constant kernel operands (VMEM-resident across grid steps) ---
    lane = jnp.arange(lanes)
    head_mask = (lane[:, None] // head_dim == lane[None, :] // head_dim
                 ).astype(jnp.float32)                                 # per-(dst,head) segment sum
    group_mask = ((lane[:, None] // dim_out == lane[None, :] // dim_out)
                  .astype(jnp.float32) / float(dim_out))               # per-dst LN mean

    wo, bo = params["w_out"]
    eye_g = jnp.eye(g, dtype=jnp.float32)
    w_fused = jnp.concatenate(
        [jnp.kron(eye_g, wo[:dim_out]),          # attention part of the concat
         jnp.kron(eye_g, wo[dim_out:])],         # dst-node-feature part
        axis=0).astype(bf16)                                           # (lanes + g*dim_node, lanes)
    b_pk = jnp.tile(bo, g).reshape(1, lanes)
    gamma_pk = jnp.tile(params["ln_gamma"], g).reshape(1, lanes)
    beta_pk = jnp.tile(params["ln_beta"], g).reshape(1, lanes)

    out_pk = pallas_attention_output(q_pk, kv_pk, hd_pk, head_mask, group_mask,
                                     w_fused, b_pk, gamma_pk, beta_pk)
    return out_pk.reshape(dp, dim_out)[:d]


# ---------------------------- pure-JAX reference (mirrors the precision contract) ----------------------------

def reference_forward(params, num_heads, dim_out, num_dst, nbrs, node_data,
                      reverse_nids, efeat_unique, reverse_eids,
                      unique_time_delta, reverse_time_delta):
    d = num_dst
    dh = dim_out // num_heads
    bf16 = jnp.bfloat16
    tw, tb = params["time_w"], params["time_b"]
    zero_time_feat = jnp.cos(jnp.zeros((1, 1), jnp.float32) * tw[None, :] + tb[None, :])
    nbrs_time_feat = jnp.cos(unique_time_delta[:, None] * tw[None, :] + tb[None, :])

    def lin(x, p):
        w, b = p
        return jnp.dot(x.astype(bf16), w.astype(bf16),
                       preferred_element_type=jnp.float32) + b

    q_node = lin(node_data, params["w_q_node"])[reverse_nids[:d]]
    q_time = zero_time_feat @ params["w_q_time"][0] + params["w_q_time"][1]
    q_our = q_node + q_time
    dst_index = jnp.repeat(jnp.arange(d), nbrs)
    q = q_our[dst_index].astype(bf16).astype(jnp.float32)              # mirror bf16 q feed
    z = (lin(node_data, params["w_kv_node"])[reverse_nids[d:]]
         + lin(efeat_unique, params["w_kv_edge"])[reverse_eids]
         + lin(nbrs_time_feat, params["w_kv_time"])[reverse_time_delta]
         ).astype(bf16).astype(jnp.float32)                            # mirror bf16 K/V feed
    k = z[:, :dim_out].reshape(-1, num_heads, dh)
    v = z[:, dim_out:].reshape(-1, num_heads, dh)
    qh = q.reshape(-1, num_heads, dh)
    attn = jnp.sum(qh * k, axis=2)
    attn = jnp.where(attn >= 0, attn, 0.2 * attn)
    attn = jax.nn.softmax(attn.reshape(d, nbrs, num_heads), axis=1)
    out = (v.reshape(d, nbrs, num_heads, dh) * attn[..., None]).sum(axis=1).reshape(d, dim_out)
    h_dst = node_data[reverse_nids[:d]]
    wo, bo = params["w_out"]
    y = (jnp.dot(out.astype(bf16), wo[:dim_out].astype(bf16),
                 preferred_element_type=jnp.float32)
         + jnp.dot(h_dst.astype(bf16), wo[dim_out:].astype(bf16),
                   preferred_element_type=jnp.float32)
         + bo)
    y = jax.nn.relu(y)
    mu = y.mean(axis=1, keepdims=True)
    var = ((y - mu) ** 2).mean(axis=1, keepdims=True)
    return ((y - mu) / jnp.sqrt(var + 1e-5)
            * params["ln_gamma"][None, :] + params["ln_beta"][None, :])


# ---------------------------- main ----------------------------

if __name__ == "__main__":
    num_heads = 2
    dim_node = 16
    dim_edge = 8
    dim_time = 16
    dim_out = 32
    num_dst = 8
    nbrs = 4                         # fixed neighbor fan-out per destination node
    # TODO(synk): ragged degrees from a real sampler would need neighbor masking
    # (pad slots set to -inf before the softmax); not implemented here.
    num_edges = num_dst * nbrs
    n_unique_nodes = 10
    n_unique_edges = 6
    n_unique_times = 5

    key = jax.random.PRNGKey(0)
    kp, k1, k2, k3, k4, k5, k6 = jax.random.split(key, 7)
    params = init_params(kp, dim_node, dim_edge, dim_time, dim_out)

    node_data = jax.random.normal(k1, (n_unique_nodes, dim_node), jnp.float32)
    efeat_unique = jax.random.normal(k2, (n_unique_edges, dim_edge), jnp.float32)
    unique_time_delta = jax.random.uniform(k3, (n_unique_times,), jnp.float32, 0.0, 100.0)
    reverse_nids = jax.random.randint(k4, (num_dst + num_edges,), 0, n_unique_nodes)
    reverse_eids = jax.random.randint(k5, (num_edges,), 0, n_unique_edges)
    reverse_time_delta = jax.random.randint(k6, (num_edges,), 0, n_unique_times)

    out = temporal_attn_forward(params, num_heads, dim_out, num_dst, nbrs,
                                node_data, reverse_nids, efeat_unique,
                                reverse_eids, unique_time_delta, reverse_time_delta)
    out = jax.block_until_ready(out)

    ref = reference_forward(params, num_heads, dim_out, num_dst, nbrs, node_data,
                            reverse_nids, efeat_unique, reverse_eids,
                            unique_time_delta, reverse_time_delta)

    assert out.shape == (num_dst, dim_out)
    assert bool(jnp.all(jnp.isfinite(out)))
    # Reference mirrors the bf16-in/f32-acc contract; remaining gap is the
    # approximate (EUP) reciprocal in the softmax + f32 reduction ordering.
    assert bool(jnp.allclose(out, ref, atol=2e-2, rtol=2e-2)), "mismatch vs reference"
    print("KERNEL_OK")
</pallas_src>

<mosaic_0001>
module attributes {stable_mosaic.version = 11 : i64} {
  func.func @_linear_kernel(%arg0: i32, %arg1: memref<16x16xbf16, #tpu.memory_space<vmem>>, %arg2: memref<16x96xbf16, #tpu.memory_space<vmem>>, %arg3: memref<1x96xf32, #tpu.memory_space<vmem>>, %arg4: memref<16x96xf32, #tpu.memory_space<vmem>>) attributes {dimension_semantics = [#tpu.dimension_semantics<parallel>], iteration_bounds = array<i64: 1>, scalar_prefetch = 0 : i64, scratch_operands = 0 : i64, tpu.core_type = #tpu.core_type<tc>, window_params = [{transform_indices = @transform_0, window_bounds = array<i64: 16, 16>}, {pipeline_mode = #tpu.pipeline_mode<synchronous>, transform_indices = @transform_1, window_bounds = array<i64: 16, 96>}, {pipeline_mode = #tpu.pipeline_mode<synchronous>, transform_indices = @transform_2, window_bounds = array<i64: 1, 96>}, {transform_indices = @transform_3, window_bounds = array<i64: 16, 96>}]} {
    %c0 = arith.constant 0 : index
    %c0_0 = arith.constant 0 : index
    %0 = vector.load %arg1[%c0, %c0_0] : memref<16x16xbf16, #tpu.memory_space<vmem>>, vector<16x16xbf16>
    %c0_1 = arith.constant 0 : index
    %c0_2 = arith.constant 0 : index
    %1 = vector.load %arg2[%c0_1, %c0_2] : memref<16x96xbf16, #tpu.memory_space<vmem>>, vector<16x96xbf16>
    %cst = arith.constant dense<0.000000e+00> : vector<16x96xf32>
    %2 = tpu.matmul %0, %1, %cst {dimension_numbers = #tpu.dot_dimension_numbers<[1], [0], [0], [1], [0, 0, 1, 1], [], []>} : vector<16x16xbf16>, vector<16x96xbf16>, vector<16x96xf32> -> vector<16x96xf32>
    %c0_3 = arith.constant 0 : index
    %c0_4 = arith.constant 0 : index
    %3 = vector.load %arg3[%c0_3, %c0_4] : memref<1x96xf32, #tpu.memory_space<vmem>>, vector<1x96xf32>
    %4 = vector.broadcast %3 : vector<1x96xf32> to vector<16x96xf32>
    %5 = arith.addf %2, %4 : vector<16x96xf32>
    %c0_5 = arith.constant 0 : index
    %c0_6 = arith.constant 0 : index
    %6 = vector.load %arg4[%c0_5, %c0_6] : memref<16x96xf32, #tpu.memory_space<vmem>>, vector<16x96xf32>
    tpu.vector_store %arg4[%c0_5, %c0_6], %5 {strides = array<i32>} : memref<16x96xf32, #tpu.memory_space<vmem>>, vector<16x96xf32>,
    return
  }
  func.func @transform_0(%arg0: i32) -> (i32, i32) {
    %c0_i32 = arith.constant 0 : i32
    %c0_i32_0 = arith.constant 0 : i32
    return %arg0, %c0_i32 : i32, i32
  }
  func.func @transform_1(%arg0: i32) -> (i32, i32) {
    %c0_i32 = arith.constant 0 : i32
    %c0_i32_0 = arith.constant 0 : i32
    %c0_i32_1 = arith.constant 0 : i32
    return %c0_i32, %c0_i32_0 : i32, i32
  }
  func.func @transform_2(%arg0: i32) -> (i32, i32) {
    %c0_i32 = arith.constant 0 : i32
    %c0_i32_0 = arith.constant 0 : i32
    %c0_i32_1 = arith.constant 0 : i32
    return %c0_i32, %c0_i32_0 : i32, i32
  }
  func.func @transform_3(%arg0: i32) -> (i32, i32) {
    %c0_i32 = arith.constant 0 : i32
    %c0_i32_0 = arith.constant 0 : i32
    return %arg0, %c0_i32 : i32, i32
  }
}

</mosaic_0001>

<bundles_post_ra>
// kernel: tpu_custom_call.1
= control target key start
LH: loop header
LB: loop body
LE: loop exit
PB: predicated region body
PF: predicated region fallthrough
CT: control target
= control target key end

     0   :  { %8 = vsyncpa [#allocation3], 0  ;;  %s295_s0 = inlined_call_operand.hbm [shape: bf16[16,16], index: 0, kind: input, shape index: {}]   ;;  %s296_s1 = inlined_call_operand.hbm [shape: bf16[16,96], index: 1, kind: input, shape index: {}]   ;;  %s297_s2 = inlined_call_operand.vmem [shape: f32[1,96], index: 2, kind: input, shape index: {}]   ;;  %s298_s3 = inlined_call_operand.hbm [shape: f32[16,96], index: 3, kind: output, shape index: {}]  }
   0x1   :  { %9 = vsyncpa [#allocation6], 0 }
   0x2   :  { %10 = vsyncpa [#allocation4], 0  ;;  %s227_s12 = smov [#allocation2]   ;;  %s155_s16 = scalar_lea.hbm %s295_s0, 128 }
   0x3   :  { %s16_s13 = sshll.u32 %s227_s12, 4  ;;  %p156_p0 = scmp.ne.s32.totalorder %s295_s0, %s155_s16  ;;  %s17_s13 = int_to_ptr.vmem [resolvable:$true] %s16_s13 }
   0x4   :  { %p159_p1 = scmp.lt.u32.totalorder %s155_s16, %s295_s0 }
   0x6   :  { %p161_p2 = pnand %p159_p1, %p156_p0 }
   0x8   :  { %164 = shalt.err (!%p161_p2)
}
   0x9   :  { %s165_s21 = scalar_lea.vmem %s17_s13, 128  ;;  %p170_p4 = scmp.lt.s32.totalorder %s17_s13, %s17_s13 }
   0xa   :  { %p166_p3 = scmp.ne.s32.totalorder %s17_s13, %s165_s21  ;;  %p171_p5 = scmp.lt.s32.totalorder %s165_s21, %s165_s21 }
   0xc   :  { %p172_p6 = por %p171_p5, %p170_p4 }
   0xe   :  { %p173_p7 = pnand %p172_p6, %p166_p3 }
  0x10   :  { %176 = shalt.err (!%p173_p7)
}
  0x11   :  { %s228_s22 = smov 64   ;;  %s229_s23 = smov 4  }
  0x12   :  { %22 = dma.hbm_to_vmem [thread:$0]  %s295_s0, 128, %s17_s13, [#allocation3], %s228_s22, %s228_s22, %s229_s23  }
  0x13   :  { %s230_s26 = smov [#allocation5]   ;;  %s177_s30 = scalar_lea.hbm %s296_s1, 128 }
  0x14   :  { %s28_s27 = sshll.u32 %s230_s26, 4  ;;  %p178_p8 = scmp.ne.s32.totalorder %s296_s1, %s177_s30  ;;  %s29_s27 = int_to_ptr.vmem [resolvable:$true] %s28_s27 }
  0x15   :  { %p181_p9 = scmp.lt.u32.totalorder %s177_s30, %s296_s1 }
  0x17   :  { %p183_p10 = pnand %p181_p9, %p178_p8 }
  0x19   :  { %186 = shalt.err (!%p183_p10)
}
  0x1a   :  { %s187_s8 = scalar_lea.vmem %s29_s27, 128  ;;  %p192_p12 = scmp.lt.s32.totalorder %s29_s27, %s29_s27 }
  0x1b   :  { %p188_p11 = scmp.ne.s32.totalorder %s29_s27, %s187_s8  ;;  %p193_p13 = scmp.lt.s32.totalorder %s187_s8, %s187_s8 }
  0x1d   :  { %p194_p0 = por %p193_p13, %p192_p12 }
  0x1f   :  { %p195_p1 = pnand %p194_p0, %p188_p11 }
  0x21   :  { %198 = shalt.err (!%p195_p1)
}
  0x22   :  { %34 = dma.hbm_to_vmem [thread:$0]  %s296_s1, 128, %s29_s27, [#allocation6], %s228_s22, %s228_s22, %s229_s23  }
  0x23   :  { %221 = dma.done.wait [#allocation3], 128  }
  0x24   :  { %222 = vsyncadd [#allocation3], 4294967168 }
  0x25   :  { %223 = dma.done.wait [#allocation6], 128  }
  0x26   :  { %224 = vsyncadd [#allocation6], 4294967168  ;;  %v231_v0 = vmov 0.0   ;;  %vm232_vm0 = vmmov 0   ;;  %v153_v1 = vld [vmem:[#allocation5] sm:$0xff]   ;;  %v154_v2 = vld [vmem:[#allocation2] sm:$0xff]  }
  0x27   :  { %138 = vmatprep.subr.bf16.mxu0 %v231_v0  ;;  %140 = vmatprep.mubr.msk.bf16.mxu0 %vm232_vm0, %v231_v0  ;;  %vm66_vm1 = vcmask 130048   ;;  %v132_v3 = vld [vmem:[%s297_s2] ss:$0 sm:$0xff]  ;;  %s233_s12 = smov [#allocation7]   ;;  %vm111_vm2 = vcmask 785408  }
  0x28   :  { %139 = vmatpush3.bf16.msra.mxu0 %v153_v1  ;;  %s119_s13 = sshll.u32 %s233_s12, 4  ;;  %s120_s13 = int_to_ptr.vmem [resolvable:$true] %s119_s13 }
  0x29   :  { %s199_s1 = scalar_lea.vmem %s120_s13, 256  ;;  %p204_p3 = scmp.lt.s32.totalorder %s120_s13, %s120_s13 }
  0x2a   :  { %p200_p2 = scmp.ne.s32.totalorder %s120_s13, %s199_s1  ;;  %p205_p4 = scmp.lt.s32.totalorder %s199_s1, %s199_s1 }
  0x2b   :  { %141 = vmatmul.mubr.msk.bf16.vlgmr.msra.gmra.mrb[0].mxu0 %vm66_vm1, %v154_v2 }
  0x2c   :  { %p206_p5 = por %p205_p4, %p204_p3 }
  0x2e   :  { %p207_p6 = pnand %p206_p5, %p200_p2 }
  0xfe   :  { %v104_v4 = vpop.f32.mrb[0].mxu0 }
  0xff   :  { %v105_v5 = vadd.f32 %v132_v3, %v104_v4  ;;  %v142_v6 = vpop.f32.mrb[1].mxu0 }
 0x100   :  { %v107_v7 = vpop.f32.mrb[2].mxu0 }
 0x101   :  { %112 = vst.msk [vmem:[#allocation7] sm:$0xff] %vm111_vm2, %v105_v5  ;;  %v108_v8 = vadd.f32 %v132_v3, %v107_v7  ;;  %v143_v9 = vpop.f32.mrb[3].mxu0 }
 0x103   :  { %113 = vst.msk [vmem:[#allocation7 + $0x8] sm:$0xff] %vm111_vm2, %v108_v8 }
 0x104   :  { %210 = shalt.err (!%p207_p6)
}
 0x105   :  { %s211_s15 = scalar_lea.hbm %s298_s3, 256 }
 0x106   :  { %p212_p7 = scmp.ne.s32.totalorder %s298_s3, %s211_s15  ;;  %p215_p8 = scmp.lt.u32.totalorder %s211_s15, %s298_s3 }
 0x108   :  { %p217_p9 = pnand %p215_p8, %p212_p7 }
 0x10a   :  { %220 = shalt.err (!%p217_p9)
}
 0x10b   :  { %s234_s20 = smov 128   ;;  %s235_s21 = smov 8  }
 0x10c   :  { %125 = dma.vmem_to_hbm [thread:$0]  %s120_s13, 256, %s298_s3, [#allocation4], %s234_s20, %s234_s20, %s235_s21  }
 0x10d   :  { %225 = dma.done.wait [#allocation4], 256  }
 0x10e   :  { %226 = vsyncadd [#allocation4], 4294967040 }
 0x10f   :  { %129 = vsyncpa [#allocation3], 1 }
 0x110   :  { %130 = vsyncpa [#allocation6], 1 }
 0x111   :  { %131 = vsyncpa [#allocation4], 1 }

</bundles_post_ra>
